<compile_context>
chip_gen: v5e
topology: v5e:2x2
jax: 0.10.0
libtpu: 0.0.40
codegen_flags: <defaults>
</compile_context>

<pallas_src>
import functools

import jax
import jax.numpy as jnp
from jax import lax
from jax.experimental import pallas as pl
from jax.experimental.pallas import tpu as pltpu

_SUBLANE = 8
_LANE = 128
_MXU = 256


def _round_up(v, m):
    return ((v + m - 1) // m) * m


def _discriminator_kernel(n_hidden, negative_slope, x_ref, *refs):
    """refs = (w0, b0, ..., w_{n_hidden-1}, b_{n_hidden-1}, w_last, b_last, out_ref).

    Hidden layers:  h = LeakyReLU(h @ W_i + b_i)       (bf16 MXU, f32 accumulate)
    Final layer:    out = sigmoid(w_last · h^T + b)    (lane-dense (1, tile_b) row)
    """
    out_ref = refs[-1]
    params = refs[:-1]

    h = x_ref[...]                                         # (tile_b, emb) bf16
    for i in range(n_hidden):
        w = params[2 * i][...]                             # (in, hid) bf16
        b = params[2 * i + 1][...]                         # (1, hid)  f32
        acc = jnp.dot(h.astype(jnp.bfloat16), w,
                      preferred_element_type=jnp.float32)   # MXU, f32 acc
        acc = acc + b
        h = jnp.maximum(acc, negative_slope * acc)           # LeakyReLU (f32 VPU)

    # Final Linear(hid -> 1): contract the feature axis of both operands so the
    # result is produced lane-dense as (1, tile_b) — avoids a (tile_b, 1) output
    # column and its masked partial stores.
    w_last = params[-2][...]                                # (1, hid) bf16
    b_last = params[-1][...]                                # (1, 1)   f32
    logit = lax.dot_general(
        w_last, h.astype(jnp.bfloat16),
        dimension_numbers=(((1,), (1,)), ((), ())),
        preferred_element_type=jnp.float32)                  # (1, tile_b)
    scores = jax.nn.sigmoid(logit + b_last)                  # (1, tile_b) f32
    out_ref[...] = scores[None, :, :].astype(out_ref.dtype)  # (1, 1, tile_b)


def discriminator_forward(x, weights, biases, *, tile_b=None, interpret=False):
    """Run the discriminator MLP as a single batch-tiled Pallas call.

    Args:
      x:        (batch, emb_dim) float array.
      weights:  list of (in_dim, out_dim) arrays (PyTorch weights pre-transposed).
      biases:   list of (out_dim,) or (1, out_dim) arrays.
    Returns:
      (batch,) float32 sigmoid scores (matches `.view(-1)` in PyTorch).
    """
    n_layers = len(weights)
    assert n_layers >= 1 and len(biases) == n_layers
    n_hidden = n_layers - 1
    batch, emb_dim = x.shape
    assert weights[0].shape[0] == emb_dim
    assert weights[-1].shape[1] == 1

    # --- parameters: hidden weights bf16, biases f32, final layer as a row ---
    params = []
    for i in range(n_hidden):
        params.append(jnp.asarray(weights[i]).astype(jnp.bfloat16))
        params.append(jnp.asarray(biases[i], jnp.float32).reshape(1, -1))
    params.append(jnp.asarray(weights[-1], jnp.float32).reshape(1, -1)
                  .astype(jnp.bfloat16))                    # (1, hid)
    params.append(jnp.asarray(biases[-1], jnp.float32).reshape(1, 1))

    param_bytes = sum(p.size * p.dtype.itemsize for p in params)
    widest = max([emb_dim] + [int(w.shape[1]) for w in weights])

    # --- generation-aware VMEM budget ----------------------------------------
    try:
        vmem_cap = int(getattr(pltpu.get_tpu_info(), "vmem_capacity_bytes",
                               64 * 1024 * 1024))
    except Exception:
        vmem_cap = 64 * 1024 * 1024                          # v7x-safe fallback
    vmem_cap = max(vmem_cap, 32 * 1024 * 1024)
    big_vmem = vmem_cap >= 100 * 1024 * 1024                 # v5e / v6e (128 MiB)
    vmem_budget = int(vmem_cap * 0.72)                       # ~92 MiB / ~46 MiB
    vmem_cap_limit = int(vmem_cap * 0.85)

    def _vmem_estimate(tb, param_buffers):
        x_tile = tb * emb_dim * 2                            # bf16 input tile
        out_tile = tb * 4                                    # f32 score row
        act = tb * widest * (3 * 4 + 2)                      # live f32 + bf16 slabs
        return param_buffers * param_bytes + 2 * (x_tile + out_tile) + act

    # --- batch tile selection --------------------------------------------------
    def _align_tile(tb):
        return _round_up(tb, _MXU) if tb >= 2 * _MXU else _round_up(tb, _SUBLANE)

    if tile_b is None:
        tile_b = 2048 if big_vmem else 1024
    tile_b = max(_SUBLANE, min(int(tile_b), _round_up(batch, _SUBLANE)))
    if not big_vmem and batch >= 2 * _MXU:
        # v7x-class chips have 2 TensorCores: keep >= 2 grid steps so the
        # "parallel" batch axis actually shards across both cores.
        tile_b = min(tile_b, _round_up(-(-batch // 2), _MXU))
    tile_b = min(_align_tile(tile_b), _round_up(batch, _SUBLANE))
    while tile_b > _SUBLANE and _vmem_estimate(tile_b, 1) > vmem_budget:
        new_tb = _align_tile(max(_SUBLANE, tile_b // 2))
        tile_b = new_tb if new_tb < tile_b else max(_SUBLANE, tile_b - _SUBLANE)

    batch_p = _round_up(batch, tile_b)
    num_tiles = batch_p // tile_b

    # --- input: bf16 cast only; pad batch rows only when tile_b doesn't divide --
    x_b = x.astype(jnp.bfloat16)
    if batch_p != batch:
        x_b = jnp.pad(x_b, ((0, batch_p - batch), (0, 0)))

    # --- specs ------------------------------------------------------------------
    x_spec = pl.BlockSpec((tile_b, emb_dim), lambda i: (i, 0))
    # Lane-dense output: one (1, 1, tile_b) row per batch tile.
    out_spec = pl.BlockSpec((1, 1, tile_b), lambda i: (i, 0, 0))

    # --- cost estimate + compiler params ---------------------------------------
    flops = 0
    for i in range(n_hidden):
        flops += 2 * batch_p * int(weights[i].shape[0]) * int(weights[i].shape[1])
    flops += 2 * batch_p * int(weights[-1].shape[0])
    cost = pl.CostEstimate(
        flops=int(flops),
        transcendentals=int(2 * batch_p),
        bytes_accessed=int(x_b.size * 2 + param_bytes + batch_p * 4),
    )
    vmem_limit = int(min(max(_vmem_estimate(tile_b, 2) + 8 * 1024 * 1024,
                             32 * 1024 * 1024), vmem_cap_limit))
    compiler_params = pltpu.CompilerParams(
        dimension_semantics=("parallel",),   # shard batch tiles across TCs (v7x)
        vmem_limit_bytes=vmem_limit,
    )

    kernel = functools.partial(_discriminator_kernel, n_hidden, 0.2)

    def _run(single_buffer_params):
        param_specs = []
        for p in params:
            if single_buffer_params:
                # Constant block index -> DMA'd once; single buffer halves the
                # resident weight VMEM vs. the default double buffering.
                spec = pl.BlockSpec(p.shape, lambda i: (0, 0),
                                    pipeline_mode=pl.Buffered(1))
            else:
                spec = pl.BlockSpec(p.shape, lambda i: (0, 0))
            param_specs.append(spec)
        call = pl.pallas_call(
            kernel,
            grid=(num_tiles,),
            in_specs=[x_spec] + param_specs,
            out_specs=out_spec,
            out_shape=jax.ShapeDtypeStruct((num_tiles, 1, tile_b), jnp.float32),
            compiler_params=compiler_params,
            cost_estimate=cost,
            interpret=interpret,
        )
        return jax.block_until_ready(call(x_b, *params))

    try:
        out3d = _run(single_buffer_params=True)
    except Exception:
        # Fallback for Pallas versions that reject single-buffered params.
        out3d = _run(single_buffer_params=False)

    return out3d.reshape(-1)[:batch]


def make_discriminator_params(key, emb_dim, dis_layers, dis_hid_dim):
    """Deterministic synthetic init (shapes match the PyTorch module)."""
    weights, biases = [], []
    for i in range(dis_layers + 1):
        in_dim = emb_dim if i == 0 else dis_hid_dim
        out_dim = 1 if i == dis_layers else dis_hid_dim
        key, wk, bk = jax.random.split(key, 3)
        bound = 1.0 / (in_dim ** 0.5)  # PyTorch nn.Linear default init range
        # Stored as (in_dim, out_dim) == transpose of PyTorch's (out, in).
        w = jax.random.uniform(wk, (in_dim, out_dim), jnp.float32, -bound, bound)
        b = jax.random.uniform(bk, (1, out_dim), jnp.float32, -bound, bound)
        weights.append(w)
        biases.append(b)
    return weights, biases


def discriminator_reference(x, weights, biases):
    """Pure-JAX f32 reference for correctness checking."""
    h = x.astype(jnp.float32)
    n = len(weights)
    for i, (w, b) in enumerate(zip(weights, biases)):
        h = h @ w + jnp.asarray(b).reshape(1, -1)
        if i < n - 1:
            h = jnp.where(h > 0, h, 0.2 * h)
        else:
            h = jax.nn.sigmoid(h)
    return h.reshape(-1)


if __name__ == "__main__":
    # Small synthetic config consistent with the module's forward pass.
    emb_dim = 32
    dis_layers = 2
    dis_hid_dim = 64
    batch = 8

    key = jax.random.PRNGKey(0)
    key, xk = jax.random.split(key)
    x = jax.random.normal(xk, (batch, emb_dim), jnp.float32)

    weights, biases = make_discriminator_params(key, emb_dim, dis_layers, dis_hid_dim)

    out = discriminator_forward(x, weights, biases)
    out = jax.block_until_ready(out)

    ref = discriminator_reference(x, weights, biases)
    assert out.shape == (batch,), out.shape
    # bf16 weights/activations -> relaxed tolerance vs. the f32 reference.
    assert jnp.allclose(out, ref, atol=2e-2, rtol=2e-2), (out, ref)

    print("KERNEL_OK")
</pallas_src>

<mosaic_0001>
module attributes {stable_mosaic.version = 11 : i64} {
  func.func @_discriminator_kernel(%arg0: i32, %arg1: memref<8x32xbf16, #tpu.memory_space<vmem>>, %arg2: memref<32x64xbf16, #tpu.memory_space<vmem>>, %arg3: memref<1x64xf32, #tpu.memory_space<vmem>>, %arg4: memref<64x64xbf16, #tpu.memory_space<vmem>>, %arg5: memref<1x64xf32, #tpu.memory_space<vmem>>, %arg6: memref<1x64xbf16, #tpu.memory_space<vmem>>, %arg7: memref<1x1xf32, #tpu.memory_space<vmem>>, %arg8: memref<1x1x8xf32, #tpu.memory_space<vmem>>) attributes {dimension_semantics = [#tpu.dimension_semantics<parallel>], iteration_bounds = array<i64: 1>, scalar_prefetch = 0 : i64, scratch_operands = 0 : i64, tpu.core_type = #tpu.core_type<tc>, window_params = [{transform_indices = @transform_0, window_bounds = array<i64: 8, 32>}, {pipeline_mode = #tpu.pipeline_mode<synchronous>, transform_indices = @transform_1, window_bounds = array<i64: 32, 64>}, {pipeline_mode = #tpu.pipeline_mode<synchronous>, transform_indices = @transform_2, window_bounds = array<i64: 1, 64>}, {pipeline_mode = #tpu.pipeline_mode<synchronous>, transform_indices = @transform_3, window_bounds = array<i64: 64, 64>}, {pipeline_mode = #tpu.pipeline_mode<synchronous>, transform_indices = @transform_4, window_bounds = array<i64: 1, 64>}, {pipeline_mode = #tpu.pipeline_mode<synchronous>, transform_indices = @transform_5, window_bounds = array<i64: 1, 64>}, {pipeline_mode = #tpu.pipeline_mode<synchronous>, transform_indices = @transform_6, window_bounds = array<i64: 1, 1>}, {transform_indices = @transform_7, window_bounds = array<i64: 1, 1, 8>}]} {
    %c0 = arith.constant 0 : index
    %c0_0 = arith.constant 0 : index
    %0 = vector.load %arg1[%c0, %c0_0] : memref<8x32xbf16, #tpu.memory_space<vmem>>, vector<8x32xbf16>
    %c0_1 = arith.constant 0 : index
    %c0_2 = arith.constant 0 : index
    %1 = vector.load %arg2[%c0_1, %c0_2] : memref<32x64xbf16, #tpu.memory_space<vmem>>, vector<32x64xbf16>
    %c0_3 = arith.constant 0 : index
    %c0_4 = arith.constant 0 : index
    %2 = vector.load %arg3[%c0_3, %c0_4] : memref<1x64xf32, #tpu.memory_space<vmem>>, vector<1x64xf32>
    %cst = arith.constant dense<0.000000e+00> : vector<8x64xf32>
    %3 = tpu.matmul %0, %1, %cst {dimension_numbers = #tpu.dot_dimension_numbers<[1], [0], [0], [1], [0, 0, 1, 1], [], []>} : vector<8x32xbf16>, vector<32x64xbf16>, vector<8x64xf32> -> vector<8x64xf32>
    %4 = vector.broadcast %2 : vector<1x64xf32> to vector<8x64xf32>
    %5 = arith.addf %3, %4 : vector<8x64xf32>
    %cst_5 = arith.constant 2.000000e-01 : f32
    %6 = vector.broadcast %cst_5 : f32 to vector<8x64xf32>
    %7 = arith.mulf %6, %5 : vector<8x64xf32>
    %8 = arith.maximumf %5, %7 : vector<8x64xf32>
    %c0_6 = arith.constant 0 : index
    %c0_7 = arith.constant 0 : index
    %9 = vector.load %arg4[%c0_6, %c0_7] : memref<64x64xbf16, #tpu.memory_space<vmem>>, vector<64x64xbf16>
    %c0_8 = arith.constant 0 : index
    %c0_9 = arith.constant 0 : index
    %10 = vector.load %arg5[%c0_8, %c0_9] : memref<1x64xf32, #tpu.memory_space<vmem>>, vector<1x64xf32>
    %11 = arith.truncf %8 : vector<8x64xf32> to vector<8x64xbf16>
    %cst_10 = arith.constant dense<0.000000e+00> : vector<8x64xf32>
    %12 = tpu.matmul %11, %9, %cst_10 {dimension_numbers = #tpu.dot_dimension_numbers<[1], [0], [0], [1], [0, 0, 1, 1], [], []>} : vector<8x64xbf16>, vector<64x64xbf16>, vector<8x64xf32> -> vector<8x64xf32>
    %13 = vector.broadcast %10 : vector<1x64xf32> to vector<8x64xf32>
    %14 = arith.addf %12, %13 : vector<8x64xf32>
    %cst_11 = arith.constant 2.000000e-01 : f32
    %15 = vector.broadcast %cst_11 : f32 to vector<8x64xf32>
    %16 = arith.mulf %15, %14 : vector<8x64xf32>
    %17 = arith.maximumf %14, %16 : vector<8x64xf32>
    %c0_12 = arith.constant 0 : index
    %c0_13 = arith.constant 0 : index
    %18 = vector.load %arg6[%c0_12, %c0_13] : memref<1x64xbf16, #tpu.memory_space<vmem>>, vector<1x64xbf16>
    %c0_14 = arith.constant 0 : index
    %c0_15 = arith.constant 0 : index
    %19 = vector.load %arg7[%c0_14, %c0_15] : memref<1x1xf32, #tpu.memory_space<vmem>>, vector<1x1xf32>
    %20 = arith.truncf %17 : vector<8x64xf32> to vector<8x64xbf16>
    %cst_16 = arith.constant dense<0.000000e+00> : vector<1x8xf32>
    %21 = tpu.matmul %18, %20, %cst_16 {dimension_numbers = #tpu.dot_dimension_numbers<[1], [1], [0], [0], [0, 0, 1, 0], [], []>} : vector<1x64xbf16>, vector<8x64xbf16>, vector<1x8xf32> -> vector<1x8xf32>
    %22 = vector.broadcast %19 : vector<1x1xf32> to vector<1x8xf32>
    %23 = arith.addf %21, %22 : vector<1x8xf32>
    %24 = arith.negf %23 : vector<1x8xf32>
    %25 = math.exp %24 : vector<1x8xf32>
    %cst_17 = arith.constant 1.000000e+00 : f32
    %26 = vector.broadcast %cst_17 : f32 to vector<1x8xf32>
    %27 = arith.addf %26, %25 : vector<1x8xf32>
    %28 = arith.divf %26, %27 : vector<1x8xf32>
    %29 = vector.shape_cast %28 : vector<1x8xf32> to vector<1x1x8xf32>
    %c0_18 = arith.constant 0 : index
    %c0_19 = arith.constant 0 : index
    %c0_20 = arith.constant 0 : index
    %30 = vector.load %arg8[%c0_18, %c0_19, %c0_20] : memref<1x1x8xf32, #tpu.memory_space<vmem>>, vector<1x1x8xf32>
    tpu.vector_store %arg8[%c0_18, %c0_19, %c0_20], %29 {strides = array<i32>} : memref<1x1x8xf32, #tpu.memory_space<vmem>>, vector<1x1x8xf32>,
    return
  }
  func.func @transform_0(%arg0: i32) -> (i32, i32) {
    %c0_i32 = arith.constant 0 : i32
    %c0_i32_0 = arith.constant 0 : i32
    return %arg0, %c0_i32 : i32, i32
  }
  func.func @transform_1(%arg0: i32) -> (i32, i32) {
    %c0_i32 = arith.constant 0 : i32
    %c0_i32_0 = arith.constant 0 : i32
    %c0_i32_1 = arith.constant 0 : i32
    return %c0_i32, %c0_i32_0 : i32, i32
  }
  func.func @transform_2(%arg0: i32) -> (i32, i32) {
    %c0_i32 = arith.constant 0 : i32
    %c0_i32_0 = arith.constant 0 : i32
    %c0_i32_1 = arith.constant 0 : i32
    return %c0_i32, %c0_i32_0 : i32, i32
  }
  func.func @transform_3(%arg0: i32) -> (i32, i32) {
    %c0_i32 = arith.constant 0 : i32
    %c0_i32_0 = arith.constant 0 : i32
    %c0_i32_1 = arith.constant 0 : i32
    return %c0_i32, %c0_i32_0 : i32, i32
  }
  func.func @transform_4(%arg0: i32) -> (i32, i32) {
    %c0_i32 = arith.constant 0 : i32
    %c0_i32_0 = arith.constant 0 : i32
    %c0_i32_1 = arith.constant 0 : i32
    return %c0_i32, %c0_i32_0 : i32, i32
  }
  func.func @transform_5(%arg0: i32) -> (i32, i32) {
    %c0_i32 = arith.constant 0 : i32
    %c0_i32_0 = arith.constant 0 : i32
    %c0_i32_1 = arith.constant 0 : i32
    return %c0_i32, %c0_i32_0 : i32, i32
  }
  func.func @transform_6(%arg0: i32) -> (i32, i32) {
    %c0_i32 = arith.constant 0 : i32
    %c0_i32_0 = arith.constant 0 : i32
    %c0_i32_1 = arith.constant 0 : i32
    return %c0_i32, %c0_i32_0 : i32, i32
  }
  func.func @transform_7(%arg0: i32) -> (i32, i32, i32) {
    %c0_i32 = arith.constant 0 : i32
    %c0_i32_0 = arith.constant 0 : i32
    %c0_i32_1 = arith.constant 0 : i32
    return %arg0, %c0_i32, %c0_i32_0 : i32, i32, i32
  }
}

module attributes {stable_mosaic.version = 11 : i64} {
  func.func @_discriminator_kernel(%arg0: i32, %arg1: memref<8x32xbf16, #tpu.memory_space<vmem>>, %arg2: memref<32x64xbf16, #tpu.memory_space<vmem>>, %arg3: memref<1x64xf32, #tpu.memory_space<vmem>>, %arg4: memref<64x64xbf16, #tpu.memory_space<vmem>>, %arg5: memref<1x64xf32, #tpu.memory_space<vmem>>, %arg6: memref<1x64xbf16, #tpu.memory_space<vmem>>, %arg7: memref<1x1xf32, #tpu.memory_space<vmem>>, %arg8: memref<1x1x8xf32, #tpu.memory_space<vmem>>) attributes {dimension_semantics = [#tpu.dimension_semantics<parallel>], iteration_bounds = array<i64: 1>, scalar_prefetch = 0 : i64, scratch_operands = 0 : i64, tpu.core_type = #tpu.core_type<tc>, window_params = [{transform_indices = @transform_0, window_bounds = array<i64: 8, 32>}, {pipeline_mode = #tpu.pipeline_mode<synchronous>, transform_indices = @transform_1, window_bounds = array<i64: 32, 64>}, {pipeline_mode = #tpu.pipeline_mode<synchronous>, transform_indices = @transform_2, window_bounds = array<i64: 1, 64>}, {pipeline_mode = #tpu.pipeline_mode<synchronous>, transform_indices = @transform_3, window_bounds = array<i64: 64, 64>}, {pipeline_mode = #tpu.pipeline_mode<synchronous>, transform_indices = @transform_4, window_bounds = array<i64: 1, 64>}, {pipeline_mode = #tpu.pipeline_mode<synchronous>, transform_indices = @transform_5, window_bounds = array<i64: 1, 64>}, {pipeline_mode = #tpu.pipeline_mode<synchronous>, transform_indices = @transform_6, window_bounds = array<i64: 1, 1>}, {transform_indices = @transform_7, window_bounds = array<i64: 1, 1, 8>}]} {
    %c0 = arith.constant 0 : index
    %c0_0 = arith.constant 0 : index
    %0 = vector.load %arg1[%c0, %c0_0] : memref<8x32xbf16, #tpu.memory_space<vmem>>, vector<8x32xbf16>
    %c0_1 = arith.constant 0 : index
    %c0_2 = arith.constant 0 : index
    %1 = vector.load %arg2[%c0_1, %c0_2] : memref<32x64xbf16, #tpu.memory_space<vmem>>, vector<32x64xbf16>
    %c0_3 = arith.constant 0 : index
    %c0_4 = arith.constant 0 : index
    %2 = vector.load %arg3[%c0_3, %c0_4] : memref<1x64xf32, #tpu.memory_space<vmem>>, vector<1x64xf32>
    %cst = arith.constant dense<0.000000e+00> : vector<8x64xf32>
    %3 = tpu.matmul %0, %1, %cst {dimension_numbers = #tpu.dot_dimension_numbers<[1], [0], [0], [1], [0, 0, 1, 1], [], []>} : vector<8x32xbf16>, vector<32x64xbf16>, vector<8x64xf32> -> vector<8x64xf32>
    %4 = vector.broadcast %2 : vector<1x64xf32> to vector<8x64xf32>
    %5 = arith.addf %3, %4 : vector<8x64xf32>
    %cst_5 = arith.constant 2.000000e-01 : f32
    %6 = vector.broadcast %cst_5 : f32 to vector<8x64xf32>
    %7 = arith.mulf %6, %5 : vector<8x64xf32>
    %8 = arith.maximumf %5, %7 : vector<8x64xf32>
    %c0_6 = arith.constant 0 : index
    %c0_7 = arith.constant 0 : index
    %9 = vector.load %arg4[%c0_6, %c0_7] : memref<64x64xbf16, #tpu.memory_space<vmem>>, vector<64x64xbf16>
    %c0_8 = arith.constant 0 : index
    %c0_9 = arith.constant 0 : index
    %10 = vector.load %arg5[%c0_8, %c0_9] : memref<1x64xf32, #tpu.memory_space<vmem>>, vector<1x64xf32>
    %11 = arith.truncf %8 : vector<8x64xf32> to vector<8x64xbf16>
    %cst_10 = arith.constant dense<0.000000e+00> : vector<8x64xf32>
    %12 = tpu.matmul %11, %9, %cst_10 {dimension_numbers = #tpu.dot_dimension_numbers<[1], [0], [0], [1], [0, 0, 1, 1], [], []>} : vector<8x64xbf16>, vector<64x64xbf16>, vector<8x64xf32> -> vector<8x64xf32>
    %13 = vector.broadcast %10 : vector<1x64xf32> to vector<8x64xf32>
    %14 = arith.addf %12, %13 : vector<8x64xf32>
    %cst_11 = arith.constant 2.000000e-01 : f32
    %15 = vector.broadcast %cst_11 : f32 to vector<8x64xf32>
    %16 = arith.mulf %15, %14 : vector<8x64xf32>
    %17 = arith.maximumf %14, %16 : vector<8x64xf32>
    %c0_12 = arith.constant 0 : index
    %c0_13 = arith.constant 0 : index
    %18 = vector.load %arg6[%c0_12, %c0_13] : memref<1x64xbf16, #tpu.memory_space<vmem>>, vector<1x64xbf16>
    %c0_14 = arith.constant 0 : index
    %c0_15 = arith.constant 0 : index
    %19 = vector.load %arg7[%c0_14, %c0_15] : memref<1x1xf32, #tpu.memory_space<vmem>>, vector<1x1xf32>
    %20 = arith.truncf %17 : vector<8x64xf32> to vector<8x64xbf16>
    %cst_16 = arith.constant dense<0.000000e+00> : vector<1x8xf32>
    %21 = tpu.matmul %18, %20, %cst_16 {dimension_numbers = #tpu.dot_dimension_numbers<[1], [1], [0], [0], [0, 0, 1, 0], [], []>} : vector<1x64xbf16>, vector<8x64xbf16>, vector<1x8xf32> -> vector<1x8xf32>
    %22 = vector.broadcast %19 : vector<1x1xf32> to vector<1x8xf32>
    %23 = arith.addf %21, %22 : vector<1x8xf32>
    %24 = arith.negf %23 : vector<1x8xf32>
    %25 = math.exp %24 : vector<1x8xf32>
    %cst_17 = arith.constant 1.000000e+00 : f32
    %26 = vector.broadcast %cst_17 : f32 to vector<1x8xf32>
    %27 = arith.addf %26, %25 : vector<1x8xf32>
    %28 = arith.divf %26, %27 : vector<1x8xf32>
    %29 = vector.shape_cast %28 : vector<1x8xf32> to vector<1x1x8xf32>
    %c0_18 = arith.constant 0 : index
    %c0_19 = arith.constant 0 : index
    %c0_20 = arith.constant 0 : index
    %30 = vector.load %arg8[%c0_18, %c0_19, %c0_20] : memref<1x1x8xf32, #tpu.memory_space<vmem>>, vector<1x1x8xf32>
    tpu.vector_store %arg8[%c0_18, %c0_19, %c0_20], %29 {strides = array<i32>} : memref<1x1x8xf32, #tpu.memory_space<vmem>>, vector<1x1x8xf32>,
    return
  }
  func.func @transform_0(%arg0: i32) -> (i32, i32) {
    %c0_i32 = arith.constant 0 : i32
    %c0_i32_0 = arith.constant 0 : i32
    return %arg0, %c0_i32 : i32, i32
  }
  func.func @transform_1(%arg0: i32) -> (i32, i32) {
    %c0_i32 = arith.constant 0 : i32
    %c0_i32_0 = arith.constant 0 : i32
    %c0_i32_1 = arith.constant 0 : i32
    return %c0_i32, %c0_i32_0 : i32, i32
  }
  func.func @transform_2(%arg0: i32) -> (i32, i32) {
    %c0_i32 = arith.constant 0 : i32
    %c0_i32_0 = arith.constant 0 : i32
    %c0_i32_1 = arith.constant 0 : i32
    return %c0_i32, %c0_i32_0 : i32, i32
  }
  func.func @transform_3(%arg0: i32) -> (i32, i32) {
    %c0_i32 = arith.constant 0 : i32
    %c0_i32_0 = arith.constant 0 : i32
    %c0_i32_1 = arith.constant 0 : i32
    return %c0_i32, %c0_i32_0 : i32, i32
  }
  func.func @transform_4(%arg0: i32) -> (i32, i32) {
    %c0_i32 = arith.constant 0 : i32
    %c0_i32_0 = arith.constant 0 : i32
    %c0_i32_1 = arith.constant 0 : i32
    return %c0_i32, %c0_i32_0 : i32, i32
  }
  func.func @transform_5(%arg0: i32) -> (i32, i32) {
    %c0_i32 = arith.constant 0 : i32
    %c0_i32_0 = arith.constant 0 : i32
    %c0_i32_1 = arith.constant 0 : i32
    return %c0_i32, %c0_i32_0 : i32, i32
  }
  func.func @transform_6(%arg0: i32) -> (i32, i32) {
    %c0_i32 = arith.constant 0 : i32
    %c0_i32_0 = arith.constant 0 : i32
    %c0_i32_1 = arith.constant 0 : i32
    return %c0_i32, %c0_i32_0 : i32, i32
  }
  func.func @transform_7(%arg0: i32) -> (i32, i32, i32) {
    %c0_i32 = arith.constant 0 : i32
    %c0_i32_0 = arith.constant 0 : i32
    %c0_i32_1 = arith.constant 0 : i32
    return %arg0, %c0_i32, %c0_i32_0 : i32, i32, i32
  }
}

</mosaic_0001>

<bundles_post_ra>
// kernel: tpu_custom_call.1
= control target key start
LH: loop header
LB: loop body
LE: loop exit
PB: predicated region body
PF: predicated region fallthrough
CT: control target
= control target key end

     0   :  { %s462_s0 = inlined_call_operand.hbm [shape: bf16[8,32], index: 0, kind: input, shape index: {}]   ;;  %s463_s1 = inlined_call_operand.hbm [shape: bf16[32,64], index: 1, kind: input, shape index: {}]   ;;  %s464_s2 = inlined_call_operand.vmem [shape: f32[1,64], index: 2, kind: input, shape index: {}]   ;;  %s465_s3 = inlined_call_operand.hbm [shape: bf16[64,64], index: 3, kind: input, shape index: {}]   ;;  %s466_s4 = inlined_call_operand.vmem [shape: f32[1,64], index: 4, kind: input, shape index: {}]   ;;  %s467_s5 = inlined_call_operand.vmem [shape: bf16[1,64], index: 5, kind: input, shape index: {}]   ;;  %s468_s6 = inlined_call_operand.<no memory space> [shape: f32[1,1], index: 6, kind: input, shape index: {}]   ;;  %s469_s7 = inlined_call_operand.hbm [shape: f32[1,1,8], index: 7, kind: output, shape index: {}]  }
   0x1   :  { %v12_v0 = vstv %s468_s6 }
   0x2   :  { %13 = vst [vmem:[#allocation2] sm:$0x1] %v12_v0 }
   0x3   :  { %14 = vsyncpa [#allocation4], 0 }
   0x4   :  { %15 = vsyncpa [#allocation7], 0  ;;  %s32_s28 = sshll.u32 %s463_s1, 4  ;;  %s33_s28 = int_to_ptr.hbm [resolvable:$true] %s32_s28 }
   0x5   :  { %16 = vsyncpa [#allocation5], 0  ;;  %s388_s29 = smov [#allocation6]   ;;  %s22_s10 = sshll.u32 %s462_s0, 4  ;;  %s23_s10 = int_to_ptr.hbm [resolvable:$true] %s22_s10 }
   0x6   :  { %s34_s30 = sshll.u32 %s388_s29, 4  ;;  %s389_s11 = smov 64   ;;  %s35_s30 = int_to_ptr.vmem [resolvable:$true] %s34_s30 }
   0x7   :  { %s390_s12 = smov 4   ;;  %s391_s6 = smov [#allocation3]  }
   0x8   :  { %40 = dma.hbm_to_vmem [thread:$0]  %s33_s28, 256, %s35_s30, [#allocation7], %s389_s11, %s389_s11, %s390_s12  }
   0x9   :  { %s24_s13 = sshll.u32 %s391_s6, 4  ;;  %s47_s16 = sshll.u32 %s465_s3, 4  ;;  %s25_s13 = int_to_ptr.vmem [resolvable:$true] %s24_s13  ;;  %s48_s16 = int_to_ptr.hbm [resolvable:$true] %s47_s16 }
   0xa   :  { %27 = dma.hbm_to_vmem [thread:$0]  %s23_s10, 64, %s25_s13, [#allocation4]  }
   0xb   :  { %s392_s1 = smov [#allocation8]  }
   0xc   :  { %s49_s17 = sshll.u32 %s392_s1, 4  ;;  %s50_s17 = int_to_ptr.vmem [resolvable:$true] %s49_s17 }
   0xd   :  { %55 = dma.hbm_to_vmem [thread:$0]  %s48_s16, 512, %s50_s17, [#allocation7], %s389_s11, %s389_s11, %s390_s12  }
   0xe   :  { %382 = dma.done.wait [#allocation4], 64  }
   0xf   :  { %383 = vsyncadd [#allocation4], 4294967232 }
  0x10   :  { %384 = dma.done.wait [#allocation7], 768  }
  0x11   :  { %385 = vsyncadd [#allocation7], 4294966528  ;;  %v267_v1 = vld [vmem:[#allocation6 + $0x8] sm:$0xff]  ;;  %v266_v3 = vld [vmem:[#allocation6] sm:$0xff]  ;;  %vm96_vm0 = vcmask 261120   ;;  %vm152_vm1 = vcmask 523264  }
  0x12   :  { %v271_v2 = vld [vmem:[#allocation8 + $0x18] sm:$0xff]  ;;  %106 = vmatpush.bf16.msra.mxu0 %v267_v1  ;;  %v270_v4 = vld [vmem:[#allocation8 + $0x10] sm:$0xff]  ;;  %v75_v5 = vld [vmem:[#allocation3] sm:$0xf]  ;;  %v393_v16 = vmov 0   ;;  %s227_s23 = sshll.u32 %s469_s7, 4  ;;  %s228_s23 = int_to_ptr.hbm [resolvable:$true] %s227_s23 }
  0x13   :  { %160 = vmatpush.bf16.msra.mxu1 %v271_v2  ;;  %v269_v6 = vld [vmem:[#allocation8 + $0x8] sm:$0xff]  ;;  %v268_v7 = vld [vmem:[#allocation8] sm:$0xff]  ;;  %279 = vset.pattern.permute.xlu0 %v393_v16  ;;  %vm218_vm5 = vcmask 57344  }
  0x14   :  { %v280_v8 = vld [vmem:[%s464_s2] ss:$0 sm:$0xff] }
  0x15   :  { %v172_v15 = vld [vmem:[#allocation2] sm:$0x1] }
  0x16   :  { %107 = vmatpush.bf16.msra.mxu0 %v266_v3  ;;  %176 = vperm.xlu0 %279, %v172_v15   ;;  %v281_v17 = vld [vmem:[%s466_s4] ss:$0 sm:$0xff]  ;;  %s394_s4 = smov [#allocation9]  }
  0x17   :  { %161 = vmatpush.bf16.msra.mxu1 %v270_v4  ;;  %v171_v25 = vld [vmem:[%s467_s5] sm:$0x1]  ;;  %s225_s5 = sshll.u32 %s394_s4, 4  ;;  %s226_s5 = int_to_ptr.vmem [resolvable:$true] %s225_s5 }
  0x19   :  { %246 = vmatmul.msk.bf16.vlgmr.msra.gmra.mxu0 %vm96_vm0, %v75_v5 }
  0x1b   :  { %162 = vmatpush.bf16.msra.mxu1 %v269_v6 }
  0x1f   :  { %163 = vmatpush.bf16.msra.mxu1 %v268_v7 }
  0x88   :  { %v177_v26 = vpop.permute.xlu0 %176 }
  0x89   :  { %v179_v27 = vperm.slane %v177_v26, 0 }
  0x96   :  { %v109_v9 = vpop.f32.mrf.mxu0 }
  0x97   :  { %v110_v10 = vadd.f32 %v280_v8, %v109_v9 }
  0x99   :  { %v113_v11 = vmul.f32 0.2, %v110_v10 }
  0x9b   :  { %v114_v12 = vmax.f32 %v110_v10, %v113_v11 }
  0x9d   :  { %v124_v13 = vpack.c.bf16 %v114_v12, %v114_v12 }
  0x9e   :  { %v111_v14 = vpop.f32.mrf.mxu0 }
  0x9f   :  { %263 = vmatmul.msk.bf16.vlgmr.msra.gmra.mxu1 %vm152_vm1, %v124_v13 }
 0x11c   :  { %v165_v18 = vpop.f32.mrf.mxu1 }
 0x11d   :  { %v166_v19 = vadd.f32 %v281_v17, %v165_v18 }
 0x11f   :  { %v169_v20 = vmul.f32 0.2, %v166_v19 }
 0x121   :  { %v170_v21 = vmax.f32 %v166_v19, %v169_v20 }
 0x123   :  { %v173_v22 = vpack.c.bf16 %v170_v21, %v170_v21 }
 0x124   :  { %v167_v23 = vpop.f32.mrf.mxu1 }
 0x125   :  { %v184_v24 = vsel %vm152_vm1, %v173_v22, 0 }
 0x126   :  { %193 = vmatpush.bf16.xpose.msra.mxu2 %v184_v24 }
 0x12d   :  { %264 = vmatmul.msk.bf16.vlgmr.msra.gmra.mxu2 %vm152_vm1, %v171_v25 }
 0x1b0   :  { %v195_v28 = vpop.f32.mrf.mxu2 }
 0x1b1   :  { %v196_v29 = vadd.f32 %v195_v28, %v179_v27 }
 0x1b3   :  { %v265_v30 = vmul.f32 -1.442695, %v196_v29 }
 0x1b5   :  { %282 = vpow2.f32 %v265_v30 }
 0x1b8   :  { %v197_v31 = vpop.f32.mrf.mxu2 }
 0x1bb   :  { %v283_v32 = vpop.eup %282 }
 0x1bc   :  { %v202_v33 = vadd.f32 1.0, %v283_v32 }
 0x1be   :  { %284 = vrcp.f32 %v202_v33  ;;  %v214_v37 = vand.u32 2147483648, %v202_v33  ;;  %v212_v39 = vand.u32 2147483647, %v202_v33  ;;  %vm208_vm3 = vweird.f32 %v202_v33 }
 0x1c0   :  { %v215_v41 = vor.u32 1.1754944e-38, %v214_v37  ;;  %vm213_vm6 = vcmp.eq.f32.partialorder %v212_v39, 8.507059e+37 }
 0x1c4   :  { %v285_v34 = vpop.eup %284 }
 0x1c5   :  { %v204_v35 = vmul.f32 %v285_v34, %v202_v33  ;;  %vm209_vm2 = vweird.f32 %v285_v34 }
 0x1c6   :  { %vm210_vm4 = vmor %vm208_vm3, %vm209_vm2 }
 0x1c7   :  { %v205_v36 = vsub.f32 1.0, %v204_v35 }
 0x1c9   :  { %v206_v38 = vmul.f32 %v285_v34, %v205_v36 }
 0x1cb   :  { %v207_v40 = vadd.f32 %v285_v34, %v206_v38 }
 0x1cd   :  { %v211_v42 = vsel %vm210_vm4, %v285_v34, %v207_v40 }
 0x1ce   :  { %v216_v43 = vsel %vm213_vm6, %v215_v41, %v211_v42 }
 0x1cf   :  { %219 = vst.msk [vmem:[#allocation9] sm:$0x1] %vm218_vm5, %v216_v43 }
 0x1d0   :  { %230 = dma.vmem_to_hbm [thread:$0]  %s226_s5, 16, %s228_s23, [#allocation5]  }
 0x1d1   :  { %386 = dma.done.wait [#allocation5], 16  }
 0x1d2   :  { %387 = vsyncadd [#allocation5], 4294967280 }
 0x1d3   :  { %235 = vsyncpa [#allocation4], 1 }
 0x1d4   :  { %236 = vsyncpa [#allocation7], 1 }
 0x1d5   :  { %237 = vsyncpa [#allocation5], 1 }

// kernel: tpu_custom_call.1
= control target key start
LH: loop header
LB: loop body
LE: loop exit
PB: predicated region body
PF: predicated region fallthrough
CT: control target
= control target key end

     0   :  { %s462_s0 = inlined_call_operand.hbm [shape: bf16[8,32], index: 0, kind: input, shape index: {}]   ;;  %s463_s1 = inlined_call_operand.hbm [shape: bf16[32,64], index: 1, kind: input, shape index: {}]   ;;  %s464_s2 = inlined_call_operand.vmem [shape: f32[1,64], index: 2, kind: input, shape index: {}]   ;;  %s465_s3 = inlined_call_operand.hbm [shape: bf16[64,64], index: 3, kind: input, shape index: {}]   ;;  %s466_s4 = inlined_call_operand.vmem [shape: f32[1,64], index: 4, kind: input, shape index: {}]   ;;  %s467_s5 = inlined_call_operand.vmem [shape: bf16[1,64], index: 5, kind: input, shape index: {}]   ;;  %s468_s6 = inlined_call_operand.<no memory space> [shape: f32[1,1], index: 6, kind: input, shape index: {}]   ;;  %s469_s7 = inlined_call_operand.hbm [shape: f32[1,1,8], index: 7, kind: output, shape index: {}]  }
   0x1   :  { %v12_v0 = vstv %s468_s6 }
   0x2   :  { %13 = vst [vmem:[#allocation2] sm:$0x1] %v12_v0 }
   0x3   :  { %14 = vsyncpa [#allocation4], 0 }
   0x4   :  { %15 = vsyncpa [#allocation7], 0  ;;  %s32_s28 = sshll.u32 %s463_s1, 4  ;;  %s33_s28 = int_to_ptr.hbm [resolvable:$true] %s32_s28 }
   0x5   :  { %16 = vsyncpa [#allocation5], 0  ;;  %s388_s29 = smov [#allocation6]   ;;  %s22_s10 = sshll.u32 %s462_s0, 4  ;;  %s23_s10 = int_to_ptr.hbm [resolvable:$true] %s22_s10 }
   0x6   :  { %s34_s30 = sshll.u32 %s388_s29, 4  ;;  %s389_s11 = smov 64   ;;  %s35_s30 = int_to_ptr.vmem [resolvable:$true] %s34_s30 }
   0x7   :  { %s390_s12 = smov 4   ;;  %s391_s6 = smov [#allocation3]  }
   0x8   :  { %40 = dma.hbm_to_vmem [thread:$0]  %s33_s28, 256, %s35_s30, [#allocation7], %s389_s11, %s389_s11, %s390_s12  }
   0x9   :  { %s24_s13 = sshll.u32 %s391_s6, 4  ;;  %s47_s16 = sshll.u32 %s465_s3, 4  ;;  %s25_s13 = int_to_ptr.vmem [resolvable:$true] %s24_s13  ;;  %s48_s16 = int_to_ptr.hbm [resolvable:$true] %s47_s16 }
   0xa   :  { %27 = dma.hbm_to_vmem [thread:$0]  %s23_s10, 64, %s25_s13, [#allocation4]  }
   0xb   :  { %s392_s1 = smov [#allocation8]  }
   0xc   :  { %s49_s17 = sshll.u32 %s392_s1, 4  ;;  %s50_s17 = int_to_ptr.vmem [resolvable:$true] %s49_s17 }
   0xd   :  { %55 = dma.hbm_to_vmem [thread:$0]  %s48_s16, 512, %s50_s17, [#allocation7], %s389_s11, %s389_s11, %s390_s12  }
   0xe   :  { %382 = dma.done.wait [#allocation4], 64  }
   0xf   :  { %383 = vsyncadd [#allocation4], 4294967232 }
  0x10   :  { %384 = dma.done.wait [#allocation7], 768  }
  0x11   :  { %385 = vsyncadd [#allocation7], 4294966528  ;;  %v267_v1 = vld [vmem:[#allocation6 + $0x8] sm:$0xff]  ;;  %v266_v3 = vld [vmem:[#allocation6] sm:$0xff]  ;;  %vm96_vm0 = vcmask 261120   ;;  %vm152_vm1 = vcmask 523264  }
  0x12   :  { %v271_v2 = vld [vmem:[#allocation8 + $0x18] sm:$0xff]  ;;  %106 = vmatpush.bf16.msra.mxu0 %v267_v1  ;;  %v270_v4 = vld [vmem:[#allocation8 + $0x10] sm:$0xff]  ;;  %v75_v5 = vld [vmem:[#allocation3] sm:$0xf]  ;;  %v393_v16 = vmov 0   ;;  %s227_s23 = sshll.u32 %s469_s7, 4  ;;  %s228_s23 = int_to_ptr.hbm [resolvable:$true] %s227_s23 }
  0x13   :  { %160 = vmatpush.bf16.msra.mxu1 %v271_v2  ;;  %v269_v6 = vld [vmem:[#allocation8 + $0x8] sm:$0xff]  ;;  %v268_v7 = vld [vmem:[#allocation8] sm:$0xff]  ;;  %279 = vset.pattern.permute.xlu0 %v393_v16  ;;  %vm218_vm5 = vcmask 57344  }
  0x14   :  { %v280_v8 = vld [vmem:[%s464_s2] ss:$0 sm:$0xff] }
  0x15   :  { %v172_v15 = vld [vmem:[#allocation2] sm:$0x1] }
  0x16   :  { %107 = vmatpush.bf16.msra.mxu0 %v266_v3  ;;  %176 = vperm.xlu0 %279, %v172_v15   ;;  %v281_v17 = vld [vmem:[%s466_s4] ss:$0 sm:$0xff]  ;;  %s394_s4 = smov [#allocation9]  }
  0x17   :  { %161 = vmatpush.bf16.msra.mxu1 %v270_v4  ;;  %v171_v25 = vld [vmem:[%s467_s5] sm:$0x1]  ;;  %s225_s5 = sshll.u32 %s394_s4, 4  ;;  %s226_s5 = int_to_ptr.vmem [resolvable:$true] %s225_s5 }
  0x19   :  { %246 = vmatmul.msk.bf16.vlgmr.msra.gmra.mxu0 %vm96_vm0, %v75_v5 }
  0x1b   :  { %162 = vmatpush.bf16.msra.mxu1 %v269_v6 }
  0x1f   :  { %163 = vmatpush.bf16.msra.mxu1 %v268_v7 }
  0x88   :  { %v177_v26 = vpop.permute.xlu0 %176 }
  0x89   :  { %v179_v27 = vperm.slane %v177_v26, 0 }
  0x96   :  { %v109_v9 = vpop.f32.mrf.mxu0 }
  0x97   :  { %v110_v10 = vadd.f32 %v280_v8, %v109_v9 }
  0x99   :  { %v113_v11 = vmul.f32 0.2, %v110_v10 }
  0x9b   :  { %v114_v12 = vmax.f32 %v110_v10, %v113_v11 }
  0x9d   :  { %v124_v13 = vpack.c.bf16 %v114_v12, %v114_v12 }
  0x9e   :  { %v111_v14 = vpop.f32.mrf.mxu0 }
  0x9f   :  { %263 = vmatmul.msk.bf16.vlgmr.msra.gmra.mxu1 %vm152_vm1, %v124_v13 }
 0x11c   :  { %v165_v18 = vpop.f32.mrf.mxu1 }
 0x11d   :  { %v166_v19 = vadd.f32 %v281_v17, %v165_v18 }
 0x11f   :  { %v169_v20 = vmul.f32 0.2, %v166_v19 }
 0x121   :  { %v170_v21 = vmax.f32 %v166_v19, %v169_v20 }
 0x123   :  { %v173_v22 = vpack.c.bf16 %v170_v21, %v170_v21 }
 0x124   :  { %v167_v23 = vpop.f32.mrf.mxu1 }
 0x125   :  { %v184_v24 = vsel %vm152_vm1, %v173_v22, 0 }
 0x126   :  { %193 = vmatpush.bf16.xpose.msra.mxu2 %v184_v24 }
 0x12d   :  { %264 = vmatmul.msk.bf16.vlgmr.msra.gmra.mxu2 %vm152_vm1, %v171_v25 }
 0x1b0   :  { %v195_v28 = vpop.f32.mrf.mxu2 }
 0x1b1   :  { %v196_v29 = vadd.f32 %v195_v28, %v179_v27 }
 0x1b3   :  { %v265_v30 = vmul.f32 -1.442695, %v196_v29 }
 0x1b5   :  { %282 = vpow2.f32 %v265_v30 }
 0x1b8   :  { %v197_v31 = vpop.f32.mrf.mxu2 }
 0x1bb   :  { %v283_v32 = vpop.eup %282 }
 0x1bc   :  { %v202_v33 = vadd.f32 1.0, %v283_v32 }
 0x1be   :  { %284 = vrcp.f32 %v202_v33  ;;  %v214_v37 = vand.u32 2147483648, %v202_v33  ;;  %v212_v39 = vand.u32 2147483647, %v202_v33  ;;  %vm208_vm3 = vweird.f32 %v202_v33 }
 0x1c0   :  { %v215_v41 = vor.u32 1.1754944e-38, %v214_v37  ;;  %vm213_vm6 = vcmp.eq.f32.partialorder %v212_v39, 8.507059e+37 }
 0x1c4   :  { %v285_v34 = vpop.eup %284 }
 0x1c5   :  { %v204_v35 = vmul.f32 %v285_v34, %v202_v33  ;;  %vm209_vm2 = vweird.f32 %v285_v34 }
 0x1c6   :  { %vm210_vm4 = vmor %vm208_vm3, %vm209_vm2 }
 0x1c7   :  { %v205_v36 = vsub.f32 1.0, %v204_v35 }
 0x1c9   :  { %v206_v38 = vmul.f32 %v285_v34, %v205_v36 }
 0x1cb   :  { %v207_v40 = vadd.f32 %v285_v34, %v206_v38 }
 0x1cd   :  { %v211_v42 = vsel %vm210_vm4, %v285_v34, %v207_v40 }
 0x1ce   :  { %v216_v43 = vsel %vm213_vm6, %v215_v41, %v211_v42 }
 0x1cf   :  { %219 = vst.msk [vmem:[#allocation9] sm:$0x1] %vm218_vm5, %v216_v43 }
 0x1d0   :  { %230 = dma.vmem_to_hbm [thread:$0]  %s226_s5, 16, %s228_s23, [#allocation5]  }
 0x1d1   :  { %386 = dma.done.wait [#allocation5], 16  }
 0x1d2   :  { %387 = vsyncadd [#allocation5], 4294967280 }
 0x1d3   :  { %235 = vsyncpa [#allocation4], 1 }
 0x1d4   :  { %236 = vsyncpa [#allocation7], 1 }
 0x1d5   :  { %237 = vsyncpa [#allocation5], 1 }

</bundles_post_ra>
